<compile_context>
chip_gen: v7x
topology: tpu7x:2x2x1
jax: 0.10.0
libtpu: 0.0.40
codegen_flags: <defaults>
</compile_context>

<pallas_src>
import jax
import jax.numpy as jnp
from jax.experimental import pallas as pl
from jax.experimental.pallas import tpu as pltpu

_LANE = 128
_TARGET_TILE_BYTES = 2 << 20  # ~2 MiB/buffer: safe on v5e, near-roofline on v6e/v7x.


def _copy_kernel(x_ref, o_ref):
    # Pure pass-through on the current VMEM tile.
    o_ref[...] = x_ref[...]


def _sublane_multiple(dtype):
    # Sublane packing: 8 rows for 4-byte, 16 for 2-byte, 32 for 1-byte dtypes.
    return {4: 8, 2: 16, 1: 32}.get(jnp.dtype(dtype).itemsize, 8)


def _choose_lane_width(n):
    # Largest lane-dense width (multiple of 128) that divides n, capped at 4096.
    for c in (4096, 2048, 1024, 512, 256, 128):
        if n % c == 0:
            return c
    return _LANE  # caller pads up to a multiple of 128


def _identity_copy_2d(x2, total_bytes):
    """One tiled, lane-dense, aliased identity copy of a (rows, C) array."""
    rows, c = x2.shape
    itemsize = jnp.dtype(x2.dtype).itemsize
    sub = _sublane_multiple(x2.dtype)

    # ~2 MiB tile; with default double-buffering on input + output this is
    # ~8 MiB of VMEM, inside every generation's default scoped budget.
    tr = max(sub, _TARGET_TILE_BYTES // max(1, c * itemsize))
    tr = (tr // sub) * sub
    if tr >= rows:
        if rows >= 2 * sub:
            # Keep at least 2 grid steps so v7x can shard the copy across
            # both TensorCores instead of pinning all work on one.
            tr = ((pl.cdiv(rows, 2) + sub - 1) // sub) * sub
        else:
            tr = rows  # block equals full dim -> always a legal block shape

    grid = (pl.cdiv(rows, tr),)

    return pl.pallas_call(
        _copy_kernel,
        out_shape=jax.ShapeDtypeStruct((rows, c), x2.dtype),
        grid_spec=pl.GridSpec(
            grid=grid,
            in_specs=[pl.BlockSpec((tr, c), lambda i: (i, 0))],
            out_specs=pl.BlockSpec((tr, c), lambda i: (i, 0)),
        ),
        input_output_aliases={0: 0},
        compiler_params=pltpu.CompilerParams(
            dimension_semantics=("parallel",),
        ),
        cost_estimate=pl.CostEstimate(
            flops=0, transcendentals=0, bytes_accessed=2 * int(total_bytes)),
    )(x2)


def _passthrough(x):
    """Identity of `x` realized as a single lane-dense tiled Pallas copy."""
    orig_shape = x.shape
    orig_dtype = x.dtype
    itemsize = jnp.dtype(orig_dtype).itemsize
    total_bytes = x.size * itemsize

    flat = x.reshape(-1)

    # Bitcast to a 32-bit container so the sublane multiple is uniformly 8 and
    # Mosaic sees no packed-dtype layouts (byte copy is dtype-agnostic).
    bitcast = False
    pack = 1
    if orig_dtype != jnp.bool_:
        if itemsize == 4:
            if orig_dtype != jnp.uint32:
                flat = jax.lax.bitcast_convert_type(flat, jnp.uint32)
                bitcast = True
        elif itemsize in (1, 2) and (flat.size * itemsize) % 4 == 0:
            pack = 4 // itemsize
            flat = jax.lax.bitcast_convert_type(
                flat.reshape(-1, pack), jnp.uint32)
            bitcast = True

    n = flat.size
    c = _choose_lane_width(n)
    pad = (-n) % c
    if pad:
        # Pad in the wrapper so every store in the kernel is a full,
        # unmasked vst (no masked partial stores from a sub-128 last dim).
        flat = jnp.pad(flat, (0, pad))
    rows = (n + pad) // c
    x2 = flat.reshape(rows, c)

    out2 = _identity_copy_2d(x2, total_bytes)

    out_flat = out2.reshape(-1)
    if pad:
        out_flat = out_flat[:n]
    if bitcast:
        out_flat = jax.lax.bitcast_convert_type(out_flat, orig_dtype).reshape(-1)
    return out_flat.reshape(orig_shape)


# ---- EncoderDecoder wiring (mirrors the PyTorch module's structure) --------

def encode(src, src_mask):
    # TODO(synk): `encoder` is an injected submodule with no definition in the
    # spec. Its result (`memory`) is discarded downstream, so no kernel is
    # launched here (avoids 2*src.nbytes of dead HBM traffic).
    del src_mask
    return src


def tgt_embed(tgt):
    # Decoder.py's Embeddings.forward is `return x` (identity) — realized as
    # the single Pallas kernel of this forward pass.
    return _passthrough(tgt)


def decode(memory, src_mask, tgt, tgt_mask):
    # TODO(synk): `decoder` is an injected submodule with no definition in the
    # spec; return the embedded target (memory / masks threaded but unused).
    del memory, src_mask, tgt_mask
    return tgt_embed(tgt)


def encoder_decoder_forward(src, tgt, src_mask, tgt_mask):
    memory = encode(src, src_mask)
    return decode(memory, src_mask, tgt, tgt_mask)


if __name__ == "__main__":
    key = jax.random.PRNGKey(0)
    k_src, k_tgt = jax.random.split(key)

    B, S_src, S_tgt, D = 2, 16, 8, 32
    src = jax.random.normal(k_src, (B, S_src, D), dtype=jnp.float32)
    tgt = jax.random.normal(k_tgt, (B, S_tgt, D), dtype=jnp.float32)
    src_mask = jnp.ones((B, 1, S_src), dtype=jnp.float32)
    tgt_mask = jnp.tril(jnp.ones((S_tgt, S_tgt), dtype=jnp.float32))[None]

    fwd = jax.jit(encoder_decoder_forward)
    out = fwd(src, tgt, src_mask, tgt_mask)
    out = jax.block_until_ready(out)

    assert out.shape == tgt.shape and out.dtype == tgt.dtype
    assert bool(jnp.array_equal(out, tgt))
    print("KERNEL_OK")
</pallas_src>

<mosaic_0001>
module attributes {stable_mosaic.version = 11 : i64} {
  func.func @_copy_kernel(%arg0: i32, %arg1: memref<1x512xi32, #tpu.memory_space<vmem>>, %arg2: memref<1x512xi32, #tpu.memory_space<vmem>>) attributes {dimension_semantics = [#tpu.dimension_semantics<parallel>], iteration_bounds = array<i64: 1>, scalar_prefetch = 0 : i64, scratch_operands = 0 : i64, tpu.core_type = #tpu.core_type<tc>, window_params = [{transform_indices = @transform_0, window_bounds = array<i64: 1, 512>}, {transform_indices = @transform_1, window_bounds = array<i64: 1, 512>}]} {
    %c0 = arith.constant 0 : index
    %c0_0 = arith.constant 0 : index
    %0 = vector.load %arg1[%c0, %c0_0] : memref<1x512xi32, #tpu.memory_space<vmem>>, vector<1x512xi32>
    %c0_1 = arith.constant 0 : index
    %c0_2 = arith.constant 0 : index
    %1 = vector.load %arg2[%c0_1, %c0_2] : memref<1x512xi32, #tpu.memory_space<vmem>>, vector<1x512xi32>
    tpu.vector_store %arg2[%c0_1, %c0_2], %0 {strides = array<i32>} : memref<1x512xi32, #tpu.memory_space<vmem>>, vector<1x512xi32>,
    return
  }
  func.func @transform_0(%arg0: i32) -> (i32, i32) {
    %c0_i32 = arith.constant 0 : i32
    %c0_i32_0 = arith.constant 0 : i32
    return %arg0, %c0_i32 : i32, i32
  }
  func.func @transform_1(%arg0: i32) -> (i32, i32) {
    %c0_i32 = arith.constant 0 : i32
    %c0_i32_0 = arith.constant 0 : i32
    return %arg0, %c0_i32 : i32, i32
  }
}

</mosaic_0001>

<bundles_post_ra>
// kernel: encoder_decoder_forward.1
= control target key start
LH: loop header
LB: loop body
LE: loop exit
PB: predicated region body
PF: predicated region fallthrough
CT: control target
= control target key end

     0   :  { %v9_v0 = vlaneseq  ;;  %s34_s0 = inlined_call_operand.vmem [shape: u32[1,512], index: 0, kind: input, shape index: {}, may-alias: {0,1}]   ;;  %s35_s1 = inlined_call_operand.vmem [shape: u32[1,512], index: 1, kind: output, shape index: {}, may-alias: {0,1}]  }
   0x1   :  { %v8_v1 = vld [vmem:[%s34_s0] sm:$0xf] }
   0x2   :  { %vm11_vm0 = vcmp.lt.s32.totalorder %v9_v0, 512 }
   0x3   :  { %13 = vst.msk [vmem:[%s35_s1] sm:$0xf] %vm11_vm0, %v8_v1 }

</bundles_post_ra>
